<compile_context>
chip_gen: v7x
topology: tpu7x:2x2x1
jax: 0.10.0
libtpu: 0.0.40
codegen_flags: <defaults>
</compile_context>

<pallas_src>
import functools

import jax
import jax.numpy as jnp
from jax import lax
from jax.experimental import pallas as pl
from jax.experimental.pallas import tpu as pltpu

BN_EPS = 1e-5
C_PAD = 128                       # lane-dense output-channel padding (VMEM only)
VMEM_LIMIT = 32 * 1024 * 1024     # safe scoped-VMEM budget on v5e/v6e/v7x


def _round_up(x, m):
    return (x + m - 1) // m * m


def _pick_tile(size, candidates):
    for t in candidates:
        if size % t == 0:
            return t
    return None


def _pick_pass1_tiling(m_pad):
    """Return (tile_m, num_cores, blocks_per_core); m_pad is a multiple of 128.

    Prefers large tiles (512-1024 rows amortize per-grid-step overhead) and an even
    block count so the leading 'parallel' axis can shard across v7x's two TCs.
    """
    for t in (1024, 512, 256, 128):
        if m_pad % t != 0:
            continue
        blocks = m_pad // t
        if blocks % 2 == 0:
            return t, 2, blocks // 2
        if t >= 512:                       # halve the tile to get a 2-way core split
            return t // 2, 2, blocks
        return t, 1, blocks
    return 128, 1, m_pad // 128            # unreachable: m_pad is a multiple of 128


def _conv_stats_kernel(patches_ref, w_ref, sum_ref, sumsq_ref):
    """Pass 1 (stats only): conv matmul for this M tile, accumulate per-channel
    sum / sum-of-squares into resident (8, C_PAD) blocks. Conv result is discarded
    and recomputed in pass 2 (cheaper than round-tripping it through HBM)."""
    i = pl.program_id(1)

    @pl.when(i == 0)
    def _():
        sum_ref[...] = jnp.zeros_like(sum_ref)
        sumsq_ref[...] = jnp.zeros_like(sumsq_ref)

    # MXU: (tile_m, kd_pad) @ (kd_pad, C_PAD) -> f32 accumulate.
    y = jnp.dot(patches_ref[...], w_ref[...], preferred_element_type=jnp.float32)
    # (1, C_PAD) partials broadcast over the 8 sublanes of the resident block;
    # the wrapper reads sublane row 0 only.
    sum_ref[...] += jnp.sum(y, axis=0, keepdims=True)
    sumsq_ref[...] += jnp.sum(y * y, axis=0, keepdims=True)


def _conv_bn_relu_kernel(patches_ref, w_ref, scale_ref, shift_ref, o_ref):
    """Pass 2: recompute conv matmul, folded BN affine + ReLU (one FMA + max),
    transpose in VMEM and store only the real output channels (channel-major)."""
    y = jnp.dot(patches_ref[...], w_ref[...], preferred_element_type=jnp.float32)
    y = jnp.maximum(y * scale_ref[...] + shift_ref[...], 0.0)   # (tile_hw, C_PAD)
    yt = jnp.transpose(y)                                       # (C_PAD, tile_hw), XLU
    o_ref[...] = yt[: o_ref.shape[0], :].astype(o_ref.dtype)    # (c_out, tile_hw)


def _im2col_patches(x_nchw, k, hw_pad, kd_pad):
    """x: (N, C, H, W) -> bf16 patches (N * hw_pad, kd_pad), 'same' zero padding."""
    n, c, h, w = x_nchw.shape
    pad = k // 2
    # bf16 BEFORE the 9x inflation: halves the im2col intermediate's HBM traffic.
    x_nhwc = jnp.transpose(x_nchw, (0, 2, 3, 1)).astype(jnp.bfloat16)
    xp = jnp.pad(x_nhwc, ((0, 0), (pad, pad), (pad, pad), (0, 0)))
    slabs = [xp[:, dy:dy + h, dx:dx + w, :] for dy in range(k) for dx in range(k)]
    patches = jnp.concatenate(slabs, axis=-1).reshape(n, h * w, k * k * c)
    patches = jnp.pad(patches, ((0, 0), (0, hw_pad - h * w), (0, kd_pad - k * k * c)))
    return patches.reshape(n * hw_pad, kd_pad)


@functools.partial(jax.jit, static_argnames=("kernel_size",))
def fused_conv_bn_relu(x_nchw, w_oihw, b, gamma, beta, kernel_size=3):
    """Forward pass of FusedConvBNReLU: (N, C_in, H, W) -> (N, C_out, H, W)."""
    del b  # conv bias is exactly cancelled by train-mode BN mean subtraction
    n, c_in, h, w = x_nchw.shape
    c_out = w_oihw.shape[0]
    k = kernel_size
    hw = h * w
    kd = k * k * c_in
    kd_pad = _round_up(kd, 16)            # bf16 sublane packing for the weight tile
    hw_pad = _round_up(hw, 128)           # lane-dense spatial tiling; tail sliced off
    m_pad = n * hw_pad
    m_real = n * hw

    tile_m1, num_cores, bpc = _pick_pass1_tiling(m_pad)
    tile_hw = _pick_tile(hw_pad, (2048, 1024, 512, 256, 128))
    hw_blocks = hw_pad // tile_hw

    # TODO(synk): replace wrapper-side im2col (~9x HBM inflation of the input) with
    # in-kernel shifted matmuls over an NHWC halo tile to remove the inflation entirely.
    patches = _im2col_patches(x_nchw, k, hw_pad, kd_pad)        # (m_pad, kd_pad) bf16

    # (C_out, C_in, kH, kW) -> (kd, C_out), zero-padded to (kd_pad, C_PAD): the MXU
    # operands/result are lane-dense in VMEM; only real channels ever reach HBM.
    w2d = jnp.transpose(w_oihw, (2, 3, 1, 0)).reshape(kd, c_out)
    w2d = jnp.pad(w2d, ((0, kd_pad - kd), (0, C_PAD - c_out))).astype(jnp.bfloat16)

    # ---- pass 1: per-channel sum / sum-of-squares of the conv output (stats only) ----
    flops1 = 2 * m_pad * kd_pad * C_PAD + 3 * m_pad * C_PAD
    bytes1 = m_pad * kd_pad * 2 + kd_pad * C_PAD * 2 + 2 * num_cores * 8 * C_PAD * 4
    sums, sumsqs = pl.pallas_call(
        _conv_stats_kernel,
        out_shape=(jax.ShapeDtypeStruct((num_cores, 8, C_PAD), jnp.float32),
                   jax.ShapeDtypeStruct((num_cores, 8, C_PAD), jnp.float32)),
        grid_spec=pltpu.PrefetchScalarGridSpec(
            num_scalar_prefetch=0,
            grid=(num_cores, bpc),
            in_specs=[pl.BlockSpec((tile_m1, kd_pad), lambda c, i: (c * bpc + i, 0)),
                      pl.BlockSpec((kd_pad, C_PAD), lambda c, i: (0, 0))],
            out_specs=[pl.BlockSpec((None, 8, C_PAD), lambda c, i: (c, 0, 0)),
                       pl.BlockSpec((None, 8, C_PAD), lambda c, i: (c, 0, 0))]),
        compiler_params=pltpu.CompilerParams(
            dimension_semantics=("parallel", "arbitrary"),   # core split x stats accum
            vmem_limit_bytes=VMEM_LIMIT),
        cost_estimate=pl.CostEstimate(
            flops=flops1, transcendentals=0, bytes_accessed=bytes1),
    )(patches, w2d)

    # ---- fold BN into per-channel scale/shift (tiny (C,) math, plain JAX) ----
    # Partials were broadcast over the 8 sublanes -> take sublane 0, sum over cores.
    # Zero-padded spatial rows / kd columns contribute exactly 0, so dividing by the
    # real element count m_real is correct.
    ch_sum = jnp.sum(sums[:, 0, :], axis=0)                     # (C_PAD,)
    ch_sumsq = jnp.sum(sumsqs[:, 0, :], axis=0)
    mean = ch_sum / m_real
    # TODO(synk): E[y^2]-E[y]^2 in f32 can cancel for very large M with |mean| >> std;
    # switch to a shifted/compensated form if this is scaled to huge inputs.
    var = jnp.maximum(ch_sumsq / m_real - mean * mean, 0.0)
    scale = jnp.pad(gamma.astype(jnp.float32), (0, C_PAD - c_out)) * lax.rsqrt(var + BN_EPS)
    shift = jnp.pad(beta.astype(jnp.float32), (0, C_PAD - c_out)) - mean * scale
    scale = scale.reshape(1, C_PAD)
    shift = shift.reshape(1, C_PAD)

    # ---- pass 2: recompute conv, BN affine + ReLU, transpose, channel-major store ----
    flops2 = 2 * m_pad * kd_pad * C_PAD + 3 * m_pad * C_PAD
    bytes2 = (m_pad * kd_pad * 2 + kd_pad * C_PAD * 2 + 2 * C_PAD * 4
              + m_pad * c_out * 4)
    out3 = pl.pallas_call(
        _conv_bn_relu_kernel,
        out_shape=jax.ShapeDtypeStruct((n, c_out, hw_pad), jnp.float32),
        grid_spec=pltpu.PrefetchScalarGridSpec(
            num_scalar_prefetch=0,
            grid=(n, hw_blocks),
            in_specs=[pl.BlockSpec((tile_hw, kd_pad),
                                   lambda b, i: (b * hw_blocks + i, 0)),
                      pl.BlockSpec((kd_pad, C_PAD), lambda b, i: (0, 0)),
                      pl.BlockSpec((1, C_PAD), lambda b, i: (0, 0)),
                      pl.BlockSpec((1, C_PAD), lambda b, i: (0, 0))],
            out_specs=pl.BlockSpec((None, c_out, tile_hw), lambda b, i: (b, 0, i))),
        compiler_params=pltpu.CompilerParams(
            dimension_semantics=("parallel", "parallel"),
            vmem_limit_bytes=VMEM_LIMIT),
        cost_estimate=pl.CostEstimate(
            flops=flops2, transcendentals=0, bytes_accessed=bytes2),
    )(patches, w2d, scale, shift)

    # Output is already channel-major; slice any trailing spatial padding, free reshape.
    return out3[:, :, :hw].reshape(n, c_out, h, w)


def _reference(x_nchw, w_oihw, b, gamma, beta):
    """Plain-JAX reference matching PyTorch conv + train-mode BN + ReLU."""
    pad = w_oihw.shape[-1] // 2
    y = lax.conv_general_dilated(
        x_nchw.astype(jnp.float32), w_oihw.astype(jnp.float32), (1, 1),
        padding=((pad, pad), (pad, pad)),
        dimension_numbers=("NCHW", "OIHW", "NCHW"))
    y = y + b.reshape(1, -1, 1, 1)
    mean = jnp.mean(y, axis=(0, 2, 3), keepdims=True)
    var = jnp.mean((y - mean) ** 2, axis=(0, 2, 3), keepdims=True)
    y_hat = (y - mean) * lax.rsqrt(var + BN_EPS)
    y_bn = y_hat * gamma.reshape(1, -1, 1, 1) + beta.reshape(1, -1, 1, 1)
    return jnp.maximum(y_bn, 0.0)


if __name__ == "__main__":
    # FusedConvBNReLU(in_channels=4, out_channels=8, kernel_size=3), small batch.
    N, C_IN, H, W = 2, 4, 16, 16
    C_OUT, K = 8, 3

    key = jax.random.PRNGKey(0)
    kx, kw, kb, kg, kbt = jax.random.split(key, 5)

    x = jax.random.normal(kx, (N, C_IN, H, W), dtype=jnp.float32)
    w_conv = 0.1 * jax.random.normal(kw, (C_OUT, C_IN, K, K), dtype=jnp.float32)
    b_conv = 0.1 * jax.random.normal(kb, (C_OUT,), dtype=jnp.float32)
    gamma = 1.0 + 0.1 * jax.random.normal(kg, (C_OUT,), dtype=jnp.float32)
    beta = 0.1 * jax.random.normal(kbt, (C_OUT,), dtype=jnp.float32)

    out = fused_conv_bn_relu(x, w_conv, b_conv, gamma, beta, kernel_size=K)
    out = jax.block_until_ready(out)
    assert out.shape == (N, C_OUT, H, W), out.shape

    # The kernel feeds the MXU bf16 operands (f32 accumulate, f32 BN stats), so the
    # reference uses the same bf16-rounded inputs.  The conv bias stays in the
    # reference: train-mode BN cancels it, matching the kernel which drops it.
    x_q = x.astype(jnp.bfloat16).astype(jnp.float32)
    w_q = w_conv.astype(jnp.bfloat16).astype(jnp.float32)
    ref = jax.block_until_ready(_reference(x_q, w_q, b_conv, gamma, beta))
    max_err = float(jnp.max(jnp.abs(out - ref)))
    assert jnp.allclose(out, ref, atol=2e-3, rtol=2e-3), max_err

    print("KERNEL_OK")
</pallas_src>

<mosaic_0001>
module attributes {stable_mosaic.version = 11 : i64} {
  func.func @_conv_stats_kernel(%arg0: i32, %arg1: i32, %arg2: memref<256x48xbf16, #tpu.memory_space<vmem>>, %arg3: memref<48x128xbf16, #tpu.memory_space<vmem>>, %arg4: memref<1x8x128xf32, #tpu.memory_space<vmem>>, %arg5: memref<1x8x128xf32, #tpu.memory_space<vmem>>) attributes {dimension_semantics = [#tpu.dimension_semantics<parallel>, #tpu.dimension_semantics<arbitrary>], iteration_bounds = array<i64: 2, 1>, scalar_prefetch = 0 : i64, scratch_operands = 0 : i64, tpu.core_type = #tpu.core_type<tc>, window_params = [{transform_indices = @transform_0, window_bounds = array<i64: 256, 48>}, {pipeline_mode = #tpu.pipeline_mode<synchronous>, transform_indices = @transform_1, window_bounds = array<i64: 48, 128>}, {transform_indices = @transform_2, window_bounds = array<i64: 1, 8, 128>}, {transform_indices = @transform_3, window_bounds = array<i64: 1, 8, 128>}]} {
    %c0_i32 = arith.constant 0 : i32
    %0 = arith.cmpi eq, %arg1, %c0_i32 : i32
    %1 = arith.extui %0 : i1 to i32
    %c0_i32_0 = arith.constant 0 : i32
    %2 = arith.cmpi ne, %1, %c0_i32_0 : i32
    scf.if %2 {
      %cst_18 = arith.constant 0.000000e+00 : f32
      %25 = vector.broadcast %cst_18 : f32 to vector<8x128xf32>
      %c0_19 = arith.constant 0 : index
      %c0_20 = arith.constant 0 : index
      %c0_21 = arith.constant 0 : index
      %26 = vector.load %arg4[%c0_19, %c0_20, %c0_21] : memref<1x8x128xf32, #tpu.memory_space<vmem>>, vector<1x8x128xf32>
      %27 = vector.shape_cast %26 : vector<1x8x128xf32> to vector<8x128xf32>
      %28 = vector.shape_cast %25 : vector<8x128xf32> to vector<1x8x128xf32>
      tpu.vector_store %arg4[%c0_19, %c0_20, %c0_21], %28 {strides = array<i32>} : memref<1x8x128xf32, #tpu.memory_space<vmem>>, vector<1x8x128xf32>,
      %cst_22 = arith.constant 0.000000e+00 : f32
      %29 = vector.broadcast %cst_22 : f32 to vector<8x128xf32>
      %c0_23 = arith.constant 0 : index
      %c0_24 = arith.constant 0 : index
      %c0_25 = arith.constant 0 : index
      %30 = vector.load %arg5[%c0_23, %c0_24, %c0_25] : memref<1x8x128xf32, #tpu.memory_space<vmem>>, vector<1x8x128xf32>
      %31 = vector.shape_cast %30 : vector<1x8x128xf32> to vector<8x128xf32>
      %32 = vector.shape_cast %29 : vector<8x128xf32> to vector<1x8x128xf32>
      tpu.vector_store %arg5[%c0_23, %c0_24, %c0_25], %32 {strides = array<i32>} : memref<1x8x128xf32, #tpu.memory_space<vmem>>, vector<1x8x128xf32>,
    } else {
    }
    %c0 = arith.constant 0 : index
    %c0_1 = arith.constant 0 : index
    %3 = vector.load %arg2[%c0, %c0_1] : memref<256x48xbf16, #tpu.memory_space<vmem>>, vector<256x48xbf16>
    %c0_2 = arith.constant 0 : index
    %c0_3 = arith.constant 0 : index
    %4 = vector.load %arg3[%c0_2, %c0_3] : memref<48x128xbf16, #tpu.memory_space<vmem>>, vector<48x128xbf16>
    %cst = arith.constant dense<0.000000e+00> : vector<256x128xf32>
    %5 = tpu.matmul %3, %4, %cst {dimension_numbers = #tpu.dot_dimension_numbers<[1], [0], [0], [1], [0, 0, 1, 1], [], []>} : vector<256x48xbf16>, vector<48x128xbf16>, vector<256x128xf32> -> vector<256x128xf32>
    %c0_4 = arith.constant 0 : index
    %c0_5 = arith.constant 0 : index
    %c0_6 = arith.constant 0 : index
    %6 = vector.load %arg4[%c0_4, %c0_5, %c0_6] : memref<1x8x128xf32, #tpu.memory_space<vmem>>, vector<1x8x128xf32>
    %7 = vector.shape_cast %6 : vector<1x8x128xf32> to vector<8x128xf32>
    %cst_7 = arith.constant dense<0.000000e+00> : vector<128xf32>
    %8 = vector.multi_reduction <add>, %5, %cst_7 [0] : vector<256x128xf32> to vector<128xf32>
    %9 = vector.shape_cast %8 : vector<128xf32> to vector<1x128xf32>
    %10 = vector.broadcast %9 : vector<1x128xf32> to vector<8x128xf32>
    %11 = arith.addf %7, %10 : vector<8x128xf32>
    %c0_8 = arith.constant 0 : index
    %c0_9 = arith.constant 0 : index
    %c0_10 = arith.constant 0 : index
    %12 = vector.load %arg4[%c0_8, %c0_9, %c0_10] : memref<1x8x128xf32, #tpu.memory_space<vmem>>, vector<1x8x128xf32>
    %13 = vector.shape_cast %12 : vector<1x8x128xf32> to vector<8x128xf32>
    %14 = vector.shape_cast %11 : vector<8x128xf32> to vector<1x8x128xf32>
    tpu.vector_store %arg4[%c0_8, %c0_9, %c0_10], %14 {strides = array<i32>} : memref<1x8x128xf32, #tpu.memory_space<vmem>>, vector<1x8x128xf32>,
    %c0_11 = arith.constant 0 : index
    %c0_12 = arith.constant 0 : index
    %c0_13 = arith.constant 0 : index
    %15 = vector.load %arg5[%c0_11, %c0_12, %c0_13] : memref<1x8x128xf32, #tpu.memory_space<vmem>>, vector<1x8x128xf32>
    %16 = vector.shape_cast %15 : vector<1x8x128xf32> to vector<8x128xf32>
    %17 = arith.mulf %5, %5 : vector<256x128xf32>
    %cst_14 = arith.constant dense<0.000000e+00> : vector<128xf32>
    %18 = vector.multi_reduction <add>, %17, %cst_14 [0] : vector<256x128xf32> to vector<128xf32>
    %19 = vector.shape_cast %18 : vector<128xf32> to vector<1x128xf32>
    %20 = vector.broadcast %19 : vector<1x128xf32> to vector<8x128xf32>
    %21 = arith.addf %16, %20 : vector<8x128xf32>
    %c0_15 = arith.constant 0 : index
    %c0_16 = arith.constant 0 : index
    %c0_17 = arith.constant 0 : index
    %22 = vector.load %arg5[%c0_15, %c0_16, %c0_17] : memref<1x8x128xf32, #tpu.memory_space<vmem>>, vector<1x8x128xf32>
    %23 = vector.shape_cast %22 : vector<1x8x128xf32> to vector<8x128xf32>
    %24 = vector.shape_cast %21 : vector<8x128xf32> to vector<1x8x128xf32>
    tpu.vector_store %arg5[%c0_15, %c0_16, %c0_17], %24 {strides = array<i32>} : memref<1x8x128xf32, #tpu.memory_space<vmem>>, vector<1x8x128xf32>,
    return
  }
  func.func @transform_0(%arg0: i32, %arg1: i32) -> (i32, i32) {
    %c1_i32 = arith.constant 1 : i32
    %0 = arith.muli %arg0, %c1_i32 : i32
    %1 = arith.addi %0, %arg1 : i32
    %c0_i32 = arith.constant 0 : i32
    %c0_i32_0 = arith.constant 0 : i32
    return %1, %c0_i32 : i32, i32
  }
  func.func @transform_1(%arg0: i32, %arg1: i32) -> (i32, i32) {
    %c0_i32 = arith.constant 0 : i32
    %c0_i32_0 = arith.constant 0 : i32
    %c0_i32_1 = arith.constant 0 : i32
    return %c0_i32, %c0_i32_0 : i32, i32
  }
  func.func @transform_2(%arg0: i32, %arg1: i32) -> (i32, i32, i32) {
    %c0_i32 = arith.constant 0 : i32
    %c0_i32_0 = arith.constant 0 : i32
    %c0_i32_1 = arith.constant 0 : i32
    return %arg0, %c0_i32, %c0_i32_0 : i32, i32, i32
  }
  func.func @transform_3(%arg0: i32, %arg1: i32) -> (i32, i32, i32) {
    %c0_i32 = arith.constant 0 : i32
    %c0_i32_0 = arith.constant 0 : i32
    %c0_i32_1 = arith.constant 0 : i32
    return %arg0, %c0_i32, %c0_i32_0 : i32, i32, i32
  }
}

module attributes {stable_mosaic.version = 11 : i64} {
  func.func @_conv_bn_relu_kernel(%arg0: i32, %arg1: i32, %arg2: memref<256x48xbf16, #tpu.memory_space<vmem>>, %arg3: memref<48x128xbf16, #tpu.memory_space<vmem>>, %arg4: memref<1x128xf32, #tpu.memory_space<vmem>>, %arg5: memref<1x128xf32, #tpu.memory_space<vmem>>, %arg6: memref<1x8x256xf32, #tpu.memory_space<vmem>>) attributes {dimension_semantics = [#tpu.dimension_semantics<parallel>, #tpu.dimension_semantics<parallel>], iteration_bounds = array<i64: 2, 1>, scalar_prefetch = 0 : i64, scratch_operands = 0 : i64, tpu.core_type = #tpu.core_type<tc>, window_params = [{transform_indices = @transform_0, window_bounds = array<i64: 256, 48>}, {pipeline_mode = #tpu.pipeline_mode<synchronous>, transform_indices = @transform_1, window_bounds = array<i64: 48, 128>}, {pipeline_mode = #tpu.pipeline_mode<synchronous>, transform_indices = @transform_2, window_bounds = array<i64: 1, 128>}, {pipeline_mode = #tpu.pipeline_mode<synchronous>, transform_indices = @transform_3, window_bounds = array<i64: 1, 128>}, {transform_indices = @transform_4, window_bounds = array<i64: 1, 8, 256>}]} {
    %c0 = arith.constant 0 : index
    %c0_0 = arith.constant 0 : index
    %0 = vector.load %arg2[%c0, %c0_0] : memref<256x48xbf16, #tpu.memory_space<vmem>>, vector<256x48xbf16>
    %c0_1 = arith.constant 0 : index
    %c0_2 = arith.constant 0 : index
    %1 = vector.load %arg3[%c0_1, %c0_2] : memref<48x128xbf16, #tpu.memory_space<vmem>>, vector<48x128xbf16>
    %cst = arith.constant dense<0.000000e+00> : vector<256x128xf32>
    %2 = tpu.matmul %0, %1, %cst {dimension_numbers = #tpu.dot_dimension_numbers<[1], [0], [0], [1], [0, 0, 1, 1], [], []>} : vector<256x48xbf16>, vector<48x128xbf16>, vector<256x128xf32> -> vector<256x128xf32>
    %c0_3 = arith.constant 0 : index
    %c0_4 = arith.constant 0 : index
    %3 = vector.load %arg4[%c0_3, %c0_4] : memref<1x128xf32, #tpu.memory_space<vmem>>, vector<1x128xf32>
    %4 = vector.broadcast %3 : vector<1x128xf32> to vector<256x128xf32>
    %5 = arith.mulf %2, %4 : vector<256x128xf32>
    %c0_5 = arith.constant 0 : index
    %c0_6 = arith.constant 0 : index
    %6 = vector.load %arg5[%c0_5, %c0_6] : memref<1x128xf32, #tpu.memory_space<vmem>>, vector<1x128xf32>
    %7 = vector.broadcast %6 : vector<1x128xf32> to vector<256x128xf32>
    %8 = arith.addf %5, %7 : vector<256x128xf32>
    %cst_7 = arith.constant 0.000000e+00 : f32
    %9 = vector.broadcast %cst_7 : f32 to vector<256x128xf32>
    %10 = arith.maximumf %8, %9 : vector<256x128xf32>
    %11 = tpu.transpose %10, [1, 0] : vector<256x128xf32> -> vector<128x256xf32>
    %12 = vector.extract_strided_slice %11 {offsets = [0, 0], sizes = [8, 256], strides = [1, 1]} : vector<128x256xf32> to vector<8x256xf32>
    %c0_8 = arith.constant 0 : index
    %c0_9 = arith.constant 0 : index
    %c0_10 = arith.constant 0 : index
    %13 = vector.load %arg6[%c0_8, %c0_9, %c0_10] : memref<1x8x256xf32, #tpu.memory_space<vmem>>, vector<1x8x256xf32>
    %14 = vector.shape_cast %13 : vector<1x8x256xf32> to vector<8x256xf32>
    %15 = vector.shape_cast %12 : vector<8x256xf32> to vector<1x8x256xf32>
    tpu.vector_store %arg6[%c0_8, %c0_9, %c0_10], %15 {strides = array<i32>} : memref<1x8x256xf32, #tpu.memory_space<vmem>>, vector<1x8x256xf32>,
    return
  }
  func.func @transform_0(%arg0: i32, %arg1: i32) -> (i32, i32) {
    %c1_i32 = arith.constant 1 : i32
    %0 = arith.muli %arg0, %c1_i32 : i32
    %1 = arith.addi %0, %arg1 : i32
    %c0_i32 = arith.constant 0 : i32
    %c0_i32_0 = arith.constant 0 : i32
    return %1, %c0_i32 : i32, i32
  }
  func.func @transform_1(%arg0: i32, %arg1: i32) -> (i32, i32) {
    %c0_i32 = arith.constant 0 : i32
    %c0_i32_0 = arith.constant 0 : i32
    %c0_i32_1 = arith.constant 0 : i32
    return %c0_i32, %c0_i32_0 : i32, i32
  }
  func.func @transform_2(%arg0: i32, %arg1: i32) -> (i32, i32) {
    %c0_i32 = arith.constant 0 : i32
    %c0_i32_0 = arith.constant 0 : i32
    %c0_i32_1 = arith.constant 0 : i32
    return %c0_i32, %c0_i32_0 : i32, i32
  }
  func.func @transform_3(%arg0: i32, %arg1: i32) -> (i32, i32) {
    %c0_i32 = arith.constant 0 : i32
    %c0_i32_0 = arith.constant 0 : i32
    %c0_i32_1 = arith.constant 0 : i32
    return %c0_i32, %c0_i32_0 : i32, i32
  }
  func.func @transform_4(%arg0: i32, %arg1: i32) -> (i32, i32, i32) {
    %c0_i32 = arith.constant 0 : i32
    %c0_i32_0 = arith.constant 0 : i32
    return %arg0, %c0_i32, %arg1 : i32, i32, i32
  }
}

</mosaic_0001>

<bundles_post_ra>
// kernel: fused_conv_bn_relu.3
= control target key start
LH: loop header
LB: loop body
LE: loop exit
PB: predicated region body
PF: predicated region fallthrough
CT: control target
= control target key end

     0   :  { %s1038_s15 = smov 0   ;;  %s1040_s16 = smov 0   ;;  %s1199_s0 = inlined_call_operand.vmem [shape: bf16[512,48], index: 0, kind: input, shape index: {}]   ;;  %s1200_s1 = inlined_call_operand.vmem [shape: bf16[48,128], index: 1, kind: input, shape index: {}]   ;;  %s1201_s2 = inlined_call_operand.vmem [shape: f32[1,128], index: 2, kind: input, shape index: {}]   ;;  %s1202_s3 = inlined_call_operand.vmem [shape: f32[1,128], index: 3, kind: input, shape index: {}]   ;;  %s1203_s4 = inlined_call_operand.vmem [shape: f32[2,8,256], index: 4, kind: output, shape index: {}]  }
   0x1   :  { %s1042_s17 = smov 0  }
   0x2 LB: > { %s26_s18 = sadd.s32 1, %s1007_s16  ;;  %p838_p0 = scmp.ge.s32.totalorder %s1011_s17, 1  ;;  %s1011_s17 = sphi %s1042_s17, %s14_s17   ;;  %s1007_s16 = sphi %s1040_s16, %s1205_s16   ;;  %s1003_s15 = sphi %s1038_s15, %s1204_s15  }
   0x3   : > { %p28_p1 = scmp.ge.s32.totalorder %s26_s18, 2  ;;  %p181_p2 = scmp.lt.s32.totalorder %s1011_s17, 3 }
   0x5   : > { %s1207_s18 = smov (%p28_p1, %s26_s18), 0  ;;  %p182_p3 = pnand %p838_p0, %p181_p2 }
   0x6   : > { %v970_v0 = vld [vmem:[%s1200_s1] sm:$0xff] (!%p182_p3)   ;;  %s839_s21 = sshll.u32 (!%p182_p3), %s1003_s15, 5  ;;  %v971_v1 = vld [vmem:[%s1200_s1 + $0x8] sm:$0xff] (!%p182_p3)   ;;  %v972_v2 = vld [vmem:[%s1200_s1 + $0x10] sm:$0xff] (!%p182_p3)   ;;  %vm367_vm0 = vcmask (!%p182_p3), 392192   ;;  %p221_p5 = scmp.lt.s32.totalorder (!%p182_p3), %s1003_s15, 1 }
   0x7   : > { %185 = sbr.rel (%p182_p3) target bundleno = 369 (0x171), region = 36  ;;  %p214_p4 = scmp.lt.s32.totalorder (!%p182_p3), %s839_s21, 63  ;;  %902 = vmatprep.subr.bf16.mxu0 (!%p182_p3), %v970_v0  ;;  %940 = vmatprep.subr.bf16.mxu1 (!%p182_p3), %v970_v0  ;;  %v1108_v19 = vld [vmem:[%s1201_s2] ss:$0 sm:$0xff] (!%p182_p3) }
   0x8   : > { %903 = vmatpush3.bf16.msra.mxu0 (!%p182_p3), %v970_v0  ;;  %943 = vmatpush3.bf16.msra.mxu1 (!%p182_p3), %v970_v0  ;;  %v1113_v24 = vld [vmem:[%s1202_s3] ss:$0 sm:$0xff] (!%p182_p3) }
   0x9   : > { %904 = vmatprep.subr.bf16.mxu0 (!%p182_p3), %v971_v1  ;;  %941 = vmatprep.subr.bf16.mxu1 (!%p182_p3), %v971_v1 }
   0xc   : > { %905 = vmatpush3.bf16.msra.mxu0 (!%p182_p3), %v971_v1  ;;  %944 = vmatpush3.bf16.msra.mxu1 (!%p182_p3), %v971_v1 }
   0xd   : > { %906 = vmatprep.subr.bf16.mxu0 (!%p182_p3), %v972_v2  ;;  %942 = vmatprep.subr.bf16.mxu1 (!%p182_p3), %v972_v2 }
   0xe   : > { %s1209_s21 = smov (!%p214_p4, %s839_s21), 63  ;;  %s1211_s15 = smov (!%p221_p5, %s1003_s15), 1 }
   0xf   : > { %s840_s26 = sshll.u32 %s1209_s21, 2  ;;  %s882_s8 = sshll.u32 %s1211_s15, 4 }
  0x10   : > { %s1071_s29 = scalar_lea.vmem %s1199_s0, %s840_s26  ;;  %907 = vmatpush3.bf16.msra.mxu0 %v972_v2  ;;  %945 = vmatpush3.bf16.msra.mxu1 %v972_v2  ;;  %s228_s11 = scalar_lea.vmem %s1203_s4, %s882_s8 }
  0x11   : > { %v973_v3 = vld [vmem:[%s1071_s29] sm:$0xff]   ;;  %v975_v5 = vld [vmem:[%s1071_s29 + $0x8] sm:$0xff]   ;;  %v977_v7 = vld [vmem:[%s1071_s29 + $0x10] sm:$0xff]  }
  0x12   : > { %v974_v4 = vld [vmem:[%s1071_s29 + $0x40] sm:$0xff]   ;;  %908 = vmatprep.mubr.msk.bf16.mxu0 %vm367_vm0, %v973_v3  ;;  %v976_v6 = vld [vmem:[%s1071_s29 + $0x48] sm:$0xff]   ;;  %v978_v8 = vld [vmem:[%s1071_s29 + $0x50] sm:$0xff]  }
  0x13   : > { %924 = vmatprep.mubr.msk.bf16.mxu1 %vm367_vm0, %v974_v4  ;;  %909 = vmatmul.mubr.msk.bf16.vlgmr.msra.gmra.mrb[0].mxu0 %vm367_vm0, %v975_v5  ;;  %v979_v9 = vld [vmem:[%s1071_s29 + $0x18] sm:$0xff]   ;;  %v981_v11 = vld [vmem:[%s1071_s29 + $0x20] sm:$0xff]   ;;  %v983_v13 = vld [vmem:[%s1071_s29 + $0x28] sm:$0xff]  }
  0x14   : > { %925 = vmatmul.mubr.msk.bf16.vlgmr.msra.gmra.mrb[0].mxu1 %vm367_vm0, %v976_v6  ;;  %912 = vmatprep.mubr.msk.bf16.mxu0 %vm367_vm0, %v977_v7  ;;  %v980_v10 = vld [vmem:[%s1071_s29 + $0x58] sm:$0xff]   ;;  %v982_v12 = vld [vmem:[%s1071_s29 + $0x60] sm:$0xff]   ;;  %v984_v14 = vld [vmem:[%s1071_s29 + $0x68] sm:$0xff]  }
  0x15   : > { %928 = vmatprep.mubr.msk.bf16.mxu1 %vm367_vm0, %v978_v8  ;;  %v985_v15 = vld [vmem:[%s1071_s29 + $0x30] sm:$0xff]   ;;  %v987_v17 = vld [vmem:[%s1071_s29 + $0x38] sm:$0xff]  }
  0x16   : > { %v986_v16 = vld [vmem:[%s1071_s29 + $0x70] sm:$0xff]   ;;  %v988_v18 = vld [vmem:[%s1071_s29 + $0x78] sm:$0xff]  }
  0x1b   : > { %913 = vmatmul.mubr.msk.bf16.gmra.mrb[4].mxu0 %vm367_vm0, %v979_v9 }
  0x1c   : > { %929 = vmatmul.mubr.msk.bf16.gmra.mrb[4].mxu1 %vm367_vm0, %v980_v10  ;;  %916 = vmatprep.mubr.msk.bf16.mxu0 %vm367_vm0, %v981_v11 }
  0x1d   : > { %932 = vmatprep.mubr.msk.bf16.mxu1 %vm367_vm0, %v982_v12 }
  0x23   : > { %917 = vmatmul.mubr.msk.bf16.gmra.mrb[8].mxu0 %vm367_vm0, %v983_v13 }
  0x24   : > { %933 = vmatmul.mubr.msk.bf16.gmra.mrb[8].mxu1 %vm367_vm0, %v984_v14  ;;  %920 = vmatprep.mubr.msk.bf16.mxu0 %vm367_vm0, %v985_v15 }
  0x25   : > { %936 = vmatprep.mubr.msk.bf16.mxu1 %vm367_vm0, %v986_v16 }
  0x2b   : > { %921 = vmatmul.mubr.msk.bf16.gmra.mrb[12].mxu0 %vm367_vm0, %v987_v17 }
  0x2c   : > { %937 = vmatmul.mubr.msk.bf16.gmra.mrb[12].mxu1 %vm367_vm0, %v988_v18 }
  0xe6   : > { %v910_v20 = vpop.f32.mrb[0].mxu0 }
  0xe7   : > { %v926_v21 = vpop.f32.mrb[0].mxu1  ;;  %v450_v22 = vpop.f32.mrb[1].mxu0  ;;  %v586_v35 = vmul.f32 %v910_v20, %v1108_v19 }
  0xe8   : > { %v514_v23 = vpop.f32.mrb[1].mxu1  ;;  %v584_v25 = vmul.f32 %v1108_v19, %v450_v22  ;;  %v911_v27 = vpop.f32.mrb[2].mxu0  ;;  %v602_v36 = vmul.f32 %v926_v21, %v1108_v19 }
  0xe9   : > { %v600_v26 = vmul.f32 %v1108_v19, %v514_v23  ;;  %v927_v28 = vpop.f32.mrb[2].mxu1  ;;  %v453_v29 = vpop.f32.mrb[3].mxu0  ;;  %v587_v43 = vmul.f32 %v911_v27, %v1108_v19  ;;  %v625_v52 = vadd.f32 %v1113_v24, %v586_v35 }
  0xea   : > { %v517_v30 = vpop.f32.mrb[3].mxu1  ;;  %v585_v31 = vmul.f32 %v1108_v19, %v453_v29  ;;  %v623_v34 = vadd.f32 %v1113_v24, %v584_v25  ;;  %v603_v44 = vmul.f32 %v927_v28, %v1108_v19  ;;  %v641_v51 = vadd.f32 %v1113_v24, %v602_v36 }
  0xeb   : > { %v601_v32 = vmul.f32 %v1108_v19, %v517_v30  ;;  %v639_v33 = vadd.f32 %v1113_v24, %v600_v26  ;;  %v657_v58 = vmax.f32 %v625_v52, 0.0  ;;  %v626_v60 = vadd.f32 %v1113_v24, %v587_v43 }
  0xec   : > { %v655_v38 = vmax.f32 %v623_v34, 0.0  ;;  %v624_v40 = vadd.f32 %v1113_v24, %v585_v31  ;;  %v673_v57 = vmax.f32 %v641_v51, 0.0  ;;  %v642_v59 = vadd.f32 %v1113_v24, %v603_v44 }
  0xed   : > { %v671_v37 = vmax.f32 %v639_v33, 0.0  ;;  %v640_v39 = vadd.f32 %v1113_v24, %v601_v32  ;;  %v658_v6 = vmax.f32 %v626_v60, 0.0 }
  0xee   : > { %687 = vxpose.xlu0.b32.start [1/16] (narrow) %v655_v38, 8  ;;  %v914_v41 = vpop.f32.mrb[4].mxu0  ;;  %v656_v48 = vmax.f32 %v624_v40, 0.0  ;;  %v674_v5 = vmax.f32 %v642_v59, 0.0 }
  0xef   : > { %719 = vxpose.xlu1.b32.start [1/16] (narrow) %v671_v37, 8  ;;  %v930_v42 = vpop.f32.mrb[4].mxu1  ;;  %v466_v45 = vpop.f32.mrb[5].mxu0  ;;  %v672_v47 = vmax.f32 %v640_v39, 0.0  ;;  %v590_v13 = vmul.f32 %v914_v41, %v1108_v19 }
  0xf0   : > { %v530_v46 = vpop.f32.mrb[5].mxu1  ;;  %v915_v49 = vpop.f32.mrb[6].mxu0  ;;  %v588_v55 = vmul.f32 %v1108_v19, %v466_v45  ;;  %v606_v14 = vmul.f32 %v930_v42, %v1108_v19 }
  0xf1   : > { %v931_v50 = vpop.f32.mrb[6].mxu1  ;;  %v469_v54 = vpop.f32.mrb[7].mxu0  ;;  %v604_v56 = vmul.f32 %v1108_v19, %v530_v46  ;;  %v591_v20 = vmul.f32 %v915_v49, %v1108_v19  ;;  %v629_v28 = vadd.f32 %v1113_v24, %v590_v13 }
  0xf2   : > { %v533_v53 = vpop.f32.mrb[7].mxu1  ;;  %688 = vxpose.xlu0.b32.cont [2/16] (narrow) %v656_v48, 8  ;;  %v627_v62 = vadd.f32 %v1113_v24, %v588_v55  ;;  %v589_v4 = vmul.f32 %v1108_v19, %v469_v54  ;;  %v607_v21 = vmul.f32 %v931_v50, %v1108_v19  ;;  %v645_v27 = vadd.f32 %v1113_v24, %v606_v14 }
  0xf3   : > { %720 = vxpose.xlu1.b32.cont [2/16] (narrow) %v672_v47, 8  ;;  %v643_v61 = vadd.f32 %v1113_v24, %v604_v56  ;;  %v605_v3 = vmul.f32 %v1108_v19, %v533_v53  ;;  %v661_v36 = vmax.f32 %v629_v28, 0.0  ;;  %v630_v38 = vadd.f32 %v1113_v24, %v591_v20 }
  0xf4   : > { %v659_v12 = vmax.f32 %v627_v62, 0.0  ;;  %v628_v16 = vadd.f32 %v1113_v24, %v589_v4  ;;  %v677_v35 = vmax.f32 %v645_v27, 0.0  ;;  %v646_v37 = vadd.f32 %v1113_v24, %v607_v21 }
  0xf5   : > { %v675_v11 = vmax.f32 %v643_v61, 0.0  ;;  %v644_v15 = vadd.f32 %v1113_v24, %v605_v3  ;;  %v662_v44 = vmax.f32 %v630_v38, 0.0 }
  0xf6   : > { %689 = vxpose.xlu0.b32.cont [3/16] (narrow) %v657_v58, 8  ;;  %v918_v63 = vpop.f32.mrb[8].mxu0  ;;  %v660_v26 = vmax.f32 %v628_v16, 0.0  ;;  %v678_v43 = vmax.f32 %v646_v37, 0.0 }
  0xf7   : > { %721 = vxpose.xlu1.b32.cont [3/16] (narrow) %v673_v57, 8  ;;  %v934_v0 = vpop.f32.mrb[8].mxu1  ;;  %v482_v1 = vpop.f32.mrb[9].mxu0  ;;  %v676_v25 = vmax.f32 %v644_v15, 0.0  ;;  %v594_v47 = vmul.f32 %v918_v63, %v1108_v19 }
  0xf8   : > { %v546_v2 = vpop.f32.mrb[9].mxu1  ;;  %v919_v7 = vpop.f32.mrb[10].mxu0  ;;  %v592_v33 = vmul.f32 %v1108_v19, %v482_v1  ;;  %v610_v48 = vmul.f32 %v934_v0, %v1108_v19 }
  0xf9   : > { %v935_v8 = vpop.f32.mrb[10].mxu1  ;;  %v485_v10 = vpop.f32.mrb[11].mxu0  ;;  %v608_v34 = vmul.f32 %v1108_v19, %v546_v2  ;;  %v595_v51 = vmul.f32 %v919_v7, %v1108_v19  ;;  %v633_v56 = vadd.f32 %v1113_v24, %v594_v47 }
  0xfa   : > { %v549_v9 = vpop.f32.mrb[11].mxu1  ;;  %690 = vxpose.xlu0.b32.cont [4/16] (narrow) %v658_v6, 8  ;;  %v631_v40 = vadd.f32 %v1113_v24, %v592_v33  ;;  %v593_v42 = vmul.f32 %v1108_v19, %v485_v10  ;;  %v611_v52 = vmul.f32 %v935_v8, %v1108_v19  ;;  %v649_v55 = vadd.f32 %v1113_v24, %v610_v48 }
  0xfb   : > { %722 = vxpose.xlu1.b32.cont [4/16] (narrow) %v674_v5, 8  ;;  %v647_v39 = vadd.f32 %v1113_v24, %v608_v34  ;;  %v609_v41 = vmul.f32 %v1108_v19, %v549_v9  ;;  %v665_v60 = vmax.f32 %v633_v56, 0.0  ;;  %v634_v62 = vadd.f32 %v1113_v24, %v595_v51 }
  0xfc   : > { %v663_v46 = vmax.f32 %v631_v40, 0.0  ;;  %v632_v50 = vadd.f32 %v1113_v24, %v593_v42  ;;  %v681_v59 = vmax.f32 %v649_v55, 0.0  ;;  %v650_v61 = vadd.f32 %v1113_v24, %v611_v52 }
  0xfd   : > { %v679_v45 = vmax.f32 %v647_v39, 0.0  ;;  %v648_v49 = vadd.f32 %v1113_v24, %v609_v41  ;;  %v666_v4 = vmax.f32 %v634_v62, 0.0 }
  0xfe   : > { %691 = vxpose.xlu0.b32.cont [5/16] (narrow) %v659_v12, 8  ;;  %v1141_v17 = vpop.f32.mrb[12].mxu0  ;;  %v664_v54 = vmax.f32 %v632_v50, 0.0  ;;  %v682_v3 = vmax.f32 %v650_v61, 0.0 }
  0xff   : > { %723 = vxpose.xlu1.b32.cont [5/16] (narrow) %v675_v11, 8  ;;  %v1143_v18 = vpop.f32.mrb[12].mxu1  ;;  %v498_v22 = vpop.f32.mrb[13].mxu0  ;;  %v680_v53 = vmax.f32 %v648_v49, 0.0  ;;  %v598_v7 = vmul.f32 %v1141_v17, %v1108_v19 }
 0x100   : > { %v562_v23 = vpop.f32.mrb[13].mxu1  ;;  %v923_v29 = vpop.f32.mrb[14].mxu0  ;;  %v596_v57 = vmul.f32 %v1108_v19, %v498_v22  ;;  %v614_v8 = vmul.f32 %v1143_v18, %v1108_v19 }
 0x101   : > { %v939_v30 = vpop.f32.mrb[14].mxu1  ;;  %v501_v32 = vpop.f32.mrb[15].mxu0  ;;  %v612_v58 = vmul.f32 %v1108_v19, %v562_v23  ;;  %v599_v11 = vmul.f32 %v923_v29, %v1108_v19  ;;  %v637_v16 = vadd.f32 %v1113_v24, %v598_v7 }
 0x102   : > { %v565_v31 = vpop.f32.mrb[15].mxu1  ;;  %692 = vxpose.xlu0.b32.cont [6/16] (narrow) %v660_v26, 8  ;;  %v635_v0 = vadd.f32 %v1113_v24, %v596_v57  ;;  %v597_v2 = vmul.f32 %v1108_v19, %v501_v32  ;;  %v615_v12 = vmul.f32 %v939_v30, %v1108_v19  ;;  %v653_v15 = vadd.f32 %v1113_v24, %v614_v8 }
 0x103   : > { %724 = vxpose.xlu1.b32.cont [6/16] (narrow) %v676_v25, 8  ;;  %v651_v63 = vadd.f32 %v1113_v24, %v612_v58  ;;  %v613_v1 = vmul.f32 %v1108_v19, %v565_v31  ;;  %v669_v18 = vmax.f32 %v637_v16, 0.0  ;;  %v638_v21 = vadd.f32 %v1113_v24, %v599_v11 }
 0x104   : > { %v667_v6 = vmax.f32 %v635_v0, 0.0  ;;  %v636_v10 = vadd.f32 %v1113_v24, %v597_v2  ;;  %v685_v17 = vmax.f32 %v653_v15, 0.0  ;;  %v654_v20 = vadd.f32 %v1113_v24, %v615_v12 }
 0x105   : > { %v683_v5 = vmax.f32 %v651_v63, 0.0  ;;  %v652_v9 = vadd.f32 %v1113_v24, %v613_v1  ;;  %v670_v19 = vmax.f32 %v638_v21, 0.0 }
 0x106   : > { %693 = vxpose.xlu0.b32.cont [7/16] (narrow) %v661_v36, 8  ;;  %v668_v14 = vmax.f32 %v636_v10, 0.0  ;;  %v686_v22 = vmax.f32 %v654_v20, 0.0 }
 0x107   : > { %725 = vxpose.xlu1.b32.cont [7/16] (narrow) %v677_v35, 8  ;;  %v684_v13 = vmax.f32 %v652_v9, 0.0 }
 0x10a   : > { %694 = vxpose.xlu0.b32.cont [8/16] (narrow) %v662_v44, 8 }
 0x10b   : > { %726 = vxpose.xlu1.b32.cont [8/16] (narrow) %v678_v43, 8 }
 0x10e   : > { %695 = vxpose.xlu0.b32.cont [9/16] (narrow) %v663_v46, 8 }
 0x10f   : > { %727 = vxpose.xlu1.b32.cont [9/16] (narrow) %v679_v45, 8 }
 0x112   : > { %696 = vxpose.xlu0.b32.cont [10/16] (narrow) %v664_v54, 8 }
 0x113   : > { %728 = vxpose.xlu1.b32.cont [10/16] (narrow) %v680_v53, 8 }
 0x116   : > { %697 = vxpose.xlu0.b32.cont [11/16] (narrow) %v665_v60, 8 }
 0x117   : > { %729 = vxpose.xlu1.b32.cont [11/16] (narrow) %v681_v59, 8 }
 0x11a   : > { %698 = vxpose.xlu0.b32.cont [12/16] (narrow) %v666_v4, 8 }
 0x11b   : > { %730 = vxpose.xlu1.b32.cont [12/16] (narrow) %v682_v3, 8 }
 0x11e   : > { %699 = vxpose.xlu0.b32.cont [13/16] (narrow) %v667_v6, 8 }
 0x11f   : > { %731 = vxpose.xlu1.b32.cont [13/16] (narrow) %v683_v5, 8 }
 0x122   : > { %700 = vxpose.xlu0.b32.cont [14/16] (narrow) %v668_v14, 8 }
 0x123   : > { %732 = vxpose.xlu1.b32.cont [14/16] (narrow) %v684_v13, 8 }
 0x126   : > { %701 = vxpose.xlu0.b32.cont [15/16] (narrow) %v669_v18, 8 }
 0x127   : > { %733 = vxpose.xlu1.b32.cont [15/16] (narrow) %v685_v17, 8 }
 0x12a   : > { %702 = vxpose.xlu0.b32.end [16/16] (narrow) %v670_v19, 8 }
 0x12b   : > { %734 = vxpose.xlu1.b32.end [16/16] (narrow) %v686_v22, 8 }
 0x16e   : > { %v703_v25 = vpop.trf.xlu0 }
 0x16f   : > { %v735_v23 = vpop.trf.xlu1  ;;  %751 = vst [vmem:[%s228_s11] sm:$0xff] %v703_v25 }
 0x170   : > { %752 = vst [vmem:[%s228_s11 + $0x8] sm:$0xff] %v735_v23 }
 0x171 PF: > { %s14_s17 = sadd.s32 1, %s1011_s17   ;;  %s1204_s15 = smov %s1007_s16 }
 0x172   : > { %p11_p6 = scmp.ge.s32.totalorder %s14_s17, 4   ;;  %s1205_s16 = smov %s1207_s18 }
 0x174   :  { %13 = sbr.rel (!%p11_p6) target bundleno = 2 (0x2), region = 66 }

// kernel: fused_conv_bn_relu.2
= control target key start
LH: loop header
LB: loop body
LE: loop exit
PB: predicated region body
PF: predicated region fallthrough
CT: control target
= control target key end

     0   :  { %s955_s12 = smov 0   ;;  %s957_s13 = smov 0   ;;  %s1069_s0 = inlined_call_operand.vmem [shape: bf16[512,48], index: 0, kind: input, shape index: {}]   ;;  %s1070_s1 = inlined_call_operand.vmem [shape: bf16[48,128], index: 1, kind: input, shape index: {}]   ;;  %s1071_s2 = inlined_call_operand.vmem [shape: f32[2,8,128], index: 2, kind: output, shape index: {0}]   ;;  %s1072_s3 = inlined_call_operand.vmem [shape: f32[2,8,128], index: 3, kind: output, shape index: {1}]  }
   0x1   :  { %s959_s14 = smov 0  }
   0x2 LB: > { %s26_s15 = sadd.s32 1, %s929_s13  ;;  %p762_p0 = scmp.ge.s32.totalorder %s933_s14, 1  ;;  %s933_s14 = sphi %s959_s14, %s14_s14   ;;  %s929_s13 = sphi %s957_s13, %s1074_s13   ;;  %s925_s12 = sphi %s955_s12, %s1073_s12  }
   0x3   : > { %p28_p1 = scmp.ge.s32.totalorder %s26_s15, 2  ;;  %p157_p2 = scmp.lt.s32.totalorder %s933_s14, 3 }
   0x5   : > { %s1076_s15 = smov (%p28_p1, %s26_s15), 0  ;;  %p158_p3 = pnand %p762_p0, %p157_p2 }
   0x6   : > { %v892_v0 = vld [vmem:[%s1070_s1] sm:$0xff] (!%p158_p3)   ;;  %s763_s18 = sshll.u32 (!%p158_p3), %s925_s12, 5  ;;  %v893_v1 = vld [vmem:[%s1070_s1 + $0x8] sm:$0xff] (!%p158_p3)   ;;  %v894_v2 = vld [vmem:[%s1070_s1 + $0x10] sm:$0xff] (!%p158_p3)   ;;  %vm344_vm0 = vcmask (!%p158_p3), 392192   ;;  %p193_p5 = scmp.lt.s32.totalorder (!%p158_p3), %s925_s12, 1 }
   0x7   : > { %161 = sbr.rel (%p158_p3) target bundleno = 311 (0x137), region = 28  ;;  %p187_p4 = scmp.lt.s32.totalorder (!%p158_p3), %s763_s18, 63  ;;  %823 = vmatprep.subr.bf16.mxu0 (!%p158_p3), %v892_v0  ;;  %861 = vmatprep.subr.bf16.mxu1 (!%p158_p3), %v892_v0 }
   0x8   : > { %824 = vmatpush3.bf16.msra.mxu0 (!%p158_p3), %v892_v0  ;;  %864 = vmatpush3.bf16.msra.mxu1 (!%p158_p3), %v892_v0 }
   0x9   : > { %825 = vmatprep.subr.bf16.mxu0 (!%p158_p3), %v893_v1  ;;  %862 = vmatprep.subr.bf16.mxu1 (!%p158_p3), %v893_v1 }
   0xc   : > { %826 = vmatpush3.bf16.msra.mxu0 (!%p158_p3), %v893_v1  ;;  %865 = vmatpush3.bf16.msra.mxu1 (!%p158_p3), %v893_v1 }
   0xd   : > { %827 = vmatprep.subr.bf16.mxu0 (!%p158_p3), %v894_v2  ;;  %863 = vmatprep.subr.bf16.mxu1 (!%p158_p3), %v894_v2 }
   0xe   : > { %s1078_s18 = smov (!%p187_p4, %s763_s18), 63  ;;  %s1080_s12 = smov (!%p193_p5, %s925_s12), 1 }
   0xf   : > { %s764_s23 = sshll.u32 %s1078_s18, 2  ;;  %s765_s27 = sshll.u32 %s1080_s12, 3 }
  0x10   : > { %s988_s26 = scalar_lea.vmem %s1069_s0, %s764_s23  ;;  %828 = vmatpush3.bf16.msra.mxu0 %v894_v2  ;;  %866 = vmatpush3.bf16.msra.mxu1 %v894_v2  ;;  %s196_s30 = scalar_lea.vmem %s1071_s2, %s765_s27 }
  0x11   : > { %v895_v3 = vld [vmem:[%s988_s26] sm:$0xff]   ;;  %v896_v4 = vld [vmem:[%s988_s26 + $0x8] sm:$0xff]   ;;  %v897_v5 = vld [vmem:[%s988_s26 + $0x10] sm:$0xff]   ;;  %s200_s6 = scalar_lea.vmem %s1072_s3, %s765_s27 }
  0x12   : > { %829 = vmatprep.mubr.msk.bf16.mxu0 %vm344_vm0, %v895_v3  ;;  %v903_v6 = vld [vmem:[%s988_s26 + $0x40] sm:$0xff]   ;;  %v904_v7 = vld [vmem:[%s988_s26 + $0x48] sm:$0xff]   ;;  %v905_v8 = vld [vmem:[%s988_s26 + $0x50] sm:$0xff]  }
  0x13   : > { %830 = vmatmul.mubr.msk.bf16.vlgmr.msra.gmra.mrb[0].mxu0 %vm344_vm0, %v896_v4  ;;  %845 = vmatprep.mubr.msk.bf16.mxu1 %vm344_vm0, %v903_v6  ;;  %v898_v9 = vld [vmem:[%s988_s26 + $0x18] sm:$0xff]   ;;  %v899_v10 = vld [vmem:[%s988_s26 + $0x20] sm:$0xff]   ;;  %v900_v13 = vld [vmem:[%s988_s26 + $0x28] sm:$0xff]  }
  0x14   : > { %833 = vmatprep.mubr.msk.bf16.mxu0 %vm344_vm0, %v897_v5  ;;  %846 = vmatmul.mubr.msk.bf16.vlgmr.msra.gmra.mrb[0].mxu1 %vm344_vm0, %v904_v7  ;;  %v906_v11 = vld [vmem:[%s988_s26 + $0x58] sm:$0xff]   ;;  %v907_v12 = vld [vmem:[%s988_s26 + $0x60] sm:$0xff]   ;;  %v901_v14 = vld [vmem:[%s988_s26 + $0x30] sm:$0xff]  }
  0x15   : > { %849 = vmatprep.mubr.msk.bf16.mxu1 %vm344_vm0, %v905_v8  ;;  %v908_v15 = vld [vmem:[%s988_s26 + $0x68] sm:$0xff]   ;;  %v909_v16 = vld [vmem:[%s988_s26 + $0x70] sm:$0xff]   ;;  %v902_v17 = vld [vmem:[%s988_s26 + $0x38] sm:$0xff]  }
  0x16   : > { %v910_v18 = vld [vmem:[%s988_s26 + $0x78] sm:$0xff]  }
  0x1b   : > { %834 = vmatmul.mubr.msk.bf16.gmra.mrb[4].mxu0 %vm344_vm0, %v898_v9 }
  0x1c   : > { %837 = vmatprep.mubr.msk.bf16.mxu0 %vm344_vm0, %v899_v10  ;;  %850 = vmatmul.mubr.msk.bf16.gmra.mrb[4].mxu1 %vm344_vm0, %v906_v11 }
  0x1d   : > { %853 = vmatprep.mubr.msk.bf16.mxu1 %vm344_vm0, %v907_v12 }
  0x23   : > { %838 = vmatmul.mubr.msk.bf16.gmra.mrb[8].mxu0 %vm344_vm0, %v900_v13 }
  0x24   : > { %841 = vmatprep.mubr.msk.bf16.mxu0 %vm344_vm0, %v901_v14  ;;  %854 = vmatmul.mubr.msk.bf16.gmra.mrb[8].mxu1 %vm344_vm0, %v908_v15 }
  0x25   : > { %857 = vmatprep.mubr.msk.bf16.mxu1 %vm344_vm0, %v909_v16 }
  0x2b   : > { %842 = vmatmul.mubr.msk.bf16.gmra.mrb[12].mxu0 %vm344_vm0, %v902_v17 }
  0x2c   : > { %858 = vmatmul.mubr.msk.bf16.gmra.mrb[12].mxu1 %vm344_vm0, %v910_v18 }
  0xe6   : > { %v831_v19 = vpop.f32.mrb[0].mxu0 }
  0xe7   : > { %v427_v20 = vpop.f32.mrb[1].mxu0  ;;  %v1022_v26 = vpop.f32.mrb[0].mxu1  ;;  %v597_v28 = vmul.f32 %v831_v19, %v831_v19 }
  0xe8   : > { %v832_v21 = vpop.f32.mrb[2].mxu0  ;;  %v595_v23 = vmul.f32 %v427_v20, %v427_v20  ;;  %v1024_v27 = vpop.f32.mrb[1].mxu1 }
  0xe9   : > { %v430_v22 = vpop.f32.mrb[3].mxu0  ;;  %v1026_v31 = vpop.f32.mrb[2].mxu1  ;;  %v598_v33 = vmul.f32 %v832_v21, %v832_v21 }
  0xea   : > { %v555_v24 = vadd.f32 %v430_v22, %v427_v20  ;;  %v596_v25 = vmul.f32 %v430_v22, %v430_v22  ;;  %v1028_v32 = vpop.f32.mrb[3].mxu1 }
  0xec   : > { %v556_v29 = vadd.f32 %v831_v19, %v555_v24  ;;  %v627_v30 = vadd.f32 %v596_v25, %v595_v23 }
  0xee   : > { %v628_v34 = vadd.f32 %v627_v30, %v597_v28  ;;  %v835_v35 = vpop.f32.mrb[4].mxu0  ;;  %v557_v36 = vadd.f32 %v832_v21, %v556_v29 }
  0xef   : > { %v443_v37 = vpop.f32.mrb[5].mxu0  ;;  %v1030_v46 = vpop.f32.mrb[4].mxu1  ;;  %v601_v48 = vmul.f32 %v835_v35, %v835_v35 }
  0xf0   : > { %v558_v38 = vadd.f32 %v557_v36, %v443_v37  ;;  %v599_v39 = vmul.f32 %v443_v37, %v443_v37  ;;  %v629_v40 = vadd.f32 %v628_v34, %v598_v33  ;;  %v836_v41 = vpop.f32.mrb[6].mxu0  ;;  %v507_v47 = vpop.f32.mrb[5].mxu1  ;;  %v611_v36 = vmul.f32 %v1024_v27, %v1024_v27 }
  0xf1   : > { %v446_v42 = vpop.f32.mrb[7].mxu0  ;;  %v1032_v51 = vpop.f32.mrb[6].mxu1  ;;  %v602_v53 = vmul.f32 %v836_v41, %v836_v41 }
  0xf2   : > { %v630_v43 = vadd.f32 %v629_v40, %v599_v39  ;;  %v559_v44 = vadd.f32 %v558_v38, %v446_v42  ;;  %v600_v45 = vmul.f32 %v446_v42, %v446_v42  ;;  %v510_v52 = vpop.f32.mrb[7].mxu1  ;;  %v613_v42 = vmul.f32 %v1022_v26, %v1022_v26 }
  0xf4   : > { %v560_v49 = vadd.f32 %v835_v35, %v559_v44  ;;  %v631_v50 = vadd.f32 %v630_v43, %v600_v45  ;;  %v614_v45 = vmul.f32 %v1026_v31, %v1026_v31 }
  0xf6   : > { %v632_v54 = vadd.f32 %v631_v50, %v601_v48  ;;  %v839_v55 = vpop.f32.mrb[8].mxu0  ;;  %v561_v56 = vadd.f32 %v836_v41, %v560_v49  ;;  %v612_v41 = vmul.f32 %v1028_v32, %v1028_v32 }
  0xf7   : > { %v459_v57 = vpop.f32.mrb[9].mxu0  ;;  %v855_v2 = vpop.f32.mrb[8].mxu1  ;;  %v605_v4 = vmul.f32 %v839_v55, %v839_v55 }
  0xf8   : > { %v562_v58 = vadd.f32 %v561_v56, %v459_v57  ;;  %v603_v59 = vmul.f32 %v459_v57, %v459_v57  ;;  %v633_v60 = vadd.f32 %v632_v54, %v602_v53  ;;  %v840_v61 = vpop.f32.mrb[10].mxu0  ;;  %v523_v3 = vpop.f32.mrb[9].mxu1  ;;  %v616_v56 = vmul.f32 %v510_v52, %v510_v52 }
  0xf9   : > { %v462_v62 = vpop.f32.mrb[11].mxu0  ;;  %v856_v7 = vpop.f32.mrb[10].mxu1  ;;  %v606_v9 = vmul.f32 %v840_v61, %v840_v61 }
  0xfa   : > { %v634_v63 = vadd.f32 %v633_v60, %v603_v59  ;;  %v563_v0 = vadd.f32 %v562_v58, %v462_v62  ;;  %v604_v1 = vmul.f32 %v462_v62, %v462_v62  ;;  %v526_v8 = vpop.f32.mrb[11].mxu1 }
  0xfc   : > { %v564_v5 = vadd.f32 %v839_v55, %v563_v0  ;;  %v635_v6 = vadd.f32 %v634_v63, %v604_v1  ;;  %v620_v0 = vmul.f32 %v526_v8, %v526_v8  ;;  %v621_v1 = vmul.f32 %v855_v2, %v855_v2 }
  0xfe   : > { %v636_v10 = vadd.f32 %v635_v6, %v605_v4  ;;  %v843_v11 = vpop.f32.mrb[12].mxu0  ;;  %v565_v12 = vadd.f32 %v840_v61, %v564_v5  ;;  %v619_v61 = vmul.f32 %v523_v3, %v523_v3  ;;  %v622_v5 = vmul.f32 %v856_v7, %v856_v7 }
  0xff   : > { %v475_v13 = vpop.f32.mrb[13].mxu0  ;;  %v859_v22 = vpop.f32.mrb[12].mxu1  ;;  %v609_v24 = vmul.f32 %v843_v11, %v843_v11 }
 0x100   : > { %v566_v14 = vadd.f32 %v565_v12, %v475_v13  ;;  %v607_v15 = vmul.f32 %v475_v13, %v475_v13  ;;  %v637_v16 = vadd.f32 %v636_v10, %v606_v9  ;;  %v844_v17 = vpop.f32.mrb[14].mxu0  ;;  %v539_v23 = vpop.f32.mrb[13].mxu1 }
 0x101   : > { %v478_v18 = vpop.f32.mrb[15].mxu0  ;;  %v860_v29 = vpop.f32.mrb[14].mxu1  ;;  %v610_v33 = vmul.f32 %v844_v17, %v844_v17  ;;  %v623_v9 = vmul.f32 %v539_v23, %v539_v23 }
 0x102   : > { %v638_v19 = vadd.f32 %v637_v16, %v607_v15  ;;  %v567_v20 = vadd.f32 %v566_v14, %v478_v18  ;;  %v608_v21 = vmul.f32 %v478_v18, %v478_v18  ;;  %v542_v30 = vpop.f32.mrb[15].mxu1  ;;  %v625_v14 = vmul.f32 %v859_v22, %v859_v22 }
 0x103   : > { %v626_v16 = vmul.f32 %v860_v29, %v860_v29 }
 0x104   : > { %v568_v25 = vadd.f32 %v843_v11, %v567_v20  ;;  %v639_v28 = vadd.f32 %v638_v19, %v608_v21 }
 0x106   : > { %v640_v34 = vadd.f32 %v639_v28, %v609_v24  ;;  %v569_v35 = vadd.f32 %v844_v17, %v568_v25 }
 0x108   : > { %v570_v37 = vadd.f32 %v569_v35, %v1024_v27  ;;  %v641_v38 = vadd.f32 %v640_v34, %v610_v33  ;;  %v615_v27 = vmul.f32 %v507_v47, %v507_v47 }
 0x10a   : > { %v642_v39 = vadd.f32 %v641_v38, %v611_v36  ;;  %v571_v40 = vadd.f32 %v570_v37, %v1028_v32  ;;  %v617_v32 = vmul.f32 %v1030_v46, %v1030_v46 }
 0x10c   : > { %v572_v43 = vadd.f32 %v1022_v26, %v571_v40  ;;  %v643_v44 = vadd.f32 %v642_v39, %v612_v41  ;;  %v618_v26 = vmul.f32 %v1032_v51, %v1032_v51 }
 0x10e   : > { %v644_v48 = vadd.f32 %v643_v44, %v613_v42  ;;  %v573_v49 = vadd.f32 %v1026_v31, %v572_v43 }
 0x110   : > { %v574_v50 = vadd.f32 %v573_v49, %v507_v47  ;;  %v645_v53 = vadd.f32 %v644_v48, %v614_v45 }
 0x112   : > { %v646_v54 = vadd.f32 %v645_v53, %v615_v27  ;;  %v575_v55 = vadd.f32 %v574_v50, %v510_v52 }
 0x114   : > { %v576_v57 = vadd.f32 %v1030_v46, %v575_v55  ;;  %v647_v58 = vadd.f32 %v646_v54, %v616_v56 }
 0x116   : > { %v648_v59 = vadd.f32 %v647_v58, %v617_v32  ;;  %v577_v60 = vadd.f32 %v1032_v51, %v576_v57  ;;  %v624_v51 = vmul.f32 %v542_v30, %v542_v30 }
 0x118   : > { %v578_v31 = vadd.f32 %v577_v60, %v523_v3  ;;  %v649_v62 = vadd.f32 %v648_v59, %v618_v26 }
 0x11a   : > { %v650_v47 = vadd.f32 %v649_v62, %v619_v61  ;;  %v579_v63 = vadd.f32 %v578_v31, %v526_v8 }
 0x11c   : > { %v580_v52 = vadd.f32 %v855_v2, %v579_v63  ;;  %v651_v4 = vadd.f32 %v650_v47, %v620_v0 }
 0x11e   : > { %v652_v6 = vadd.f32 %v651_v4, %v621_v1  ;;  %v581_v46 = vadd.f32 %v856_v7, %v580_v52 }
 0x120   : > { %v582_v10 = vadd.f32 %v581_v46, %v539_v23  ;;  %v653_v11 = vadd.f32 %v652_v6, %v622_v5 }
 0x122   : > { %v654_v12 = vadd.f32 %v653_v11, %v623_v9  ;;  %v583_v13 = vadd.f32 %v582_v10, %v542_v30 }
 0x124   : > { %v584_v3 = vadd.f32 %v859_v22, %v583_v13  ;;  %v655_v15 = vadd.f32 %v654_v12, %v624_v51 }
 0x126   : > { %v585_v17 = vadd.f32 %v860_v29, %v584_v3  ;;  %v656_v8 = vadd.f32 %v655_v15, %v625_v14 }
 0x128   : > { %v586_v2 = vrot.slane %v585_v17, 4  ;;  %v657_v18 = vadd.f32 %v656_v8, %v626_v16 }
 0x12a   : > { %v587_v19 = vadd.f32 %v586_v2, %v585_v17  ;;  %v658_v20 = vrot.slane %v657_v18, 4 }
 0x12c   : > { %v588_v7 = vrot.slane %v587_v19, 2  ;;  %v659_v21 = vadd.f32 %v658_v20, %v657_v18 }
 0x12e   : > { %v589_v23 = vadd.f32 %v588_v7, %v587_v19  ;;  %v660_v24 = vrot.slane %v659_v21, 2 }
 0x130   : > { %v590_v25 = vrot.slane %v589_v23, 1  ;;  %v661_v28 = vadd.f32 %v660_v24, %v659_v21 }
 0x132   : > { %v591_v30 = vadd.f32 %v590_v25, %v589_v23  ;;  %v662_v33 = vrot.slane %v661_v28, 1 }
 0x134   : > { %v663_v22 = vadd.f32 %v662_v33, %v661_v28  ;;  %593 = vst [vmem:[%s196_s30] sm:$0xff] %v591_v30 }
 0x136   : > { %665 = vst [vmem:[%s200_s6] sm:$0xff] %v663_v22 }
 0x137 PF: > { %s14_s14 = sadd.s32 1, %s933_s14   ;;  %s1073_s12 = smov %s929_s13 }
 0x138   : > { %p11_p6 = scmp.ge.s32.totalorder %s14_s14, 4   ;;  %s1074_s13 = smov %s1076_s15 }
 0x13a   :  { %13 = sbr.rel (!%p11_p6) target bundleno = 2 (0x2), region = 74 }

</bundles_post_ra>
